<compile_context>
chip_gen: v7x
topology: tpu7x:2x2x1
jax: 0.10.0
libtpu: 0.0.40
codegen_flags: <defaults>
</compile_context>

<pallas_src>
import math

import jax
import jax.numpy as jnp
from jax.experimental import pallas as pl
from jax.experimental.pallas import tpu as pltpu

H = W = 64  # hard-coded in the PyTorch module: pe.view(1, d_model, 64, 64)
HW = H * W


def build_positional_encoding(d_model: int, seq_len: int, dtype=jnp.float32):
    """Deterministic reconstruction of the registered 'pe' buffer.

    Build this ONCE in the model dtype and reuse it; the forward below does not
    re-cast it per call (perf-review item: hoist the dtype cast out of forward).
    """
    assert seq_len == HW, "module requires seq_len == 64*64 for the .view()"
    assert d_model % 2 == 0, "sin/cos interleave requires even d_model (same as torch module)"
    position = jnp.arange(seq_len, dtype=jnp.float32)[:, None]             # (S, 1)
    div_term = jnp.exp(
        jnp.arange(0, d_model, 2, dtype=jnp.float32) * (-math.log(10000.0) / d_model)
    )                                                                       # (C/2,)
    ang = position * div_term                                               # (S, C/2)
    pe = jnp.zeros((seq_len, d_model), dtype=jnp.float32)
    pe = pe.at[:, 0::2].set(jnp.sin(ang))
    pe = pe.at[:, 1::2].set(jnp.cos(ang))
    # torch: pe is (S, 1, C) -> permute(1, 2, 0) -> (1, C, S) -> view(1, C, 64, 64)
    pe = pe.T.reshape(1, d_model, H, W)
    return pe.astype(dtype)


# ----------------------------------------------------------------------------- kernels


def _add_pe_single_kernel(x_ref, pe_ref, o_ref):
    # x_ref: (B, C, HW), pe_ref: (C, HW) -> broadcast over the leading batch dim.
    o_ref[...] = x_ref[...] + pe_ref[...]


def _add_pe_tiled_kernel(x_ref, pe_ref, o_ref):
    # Batch dim squeezed out by BlockSpec: all refs are clean 2-D (tc, HW) tiles.
    o_ref[...] = x_ref[...] + pe_ref[...]


# ----------------------------------------------------------------------------- wrapper


def _tpu_vmem_capacity_bytes():
    """Best-effort physical VMEM query; conservative (v7x-sized) fallback."""
    try:
        info = pltpu.get_tpu_info()
        cap = getattr(info, "vmem_capacity_bytes", None)
        if cap:
            return int(cap)
    except Exception:
        pass
    return 64 * 1024 * 1024


def _choose_c_tile(C: int, itemsize: int, max_block_bytes: int):
    """Largest C-tile that is a multiple of the sublane pack, divides C, and keeps a
    single (tc, HW) block under max_block_bytes.  Returns (tc, pack); tc is None if no
    legal multiple-of-pack tile exists (caller falls back to tc == C)."""
    pack = max(8, 32 // itemsize)                 # 8 (f32) / 16 (bf16) / 32 (i8)
    cap = max(pack, max_block_bytes // (HW * itemsize))
    best = None
    t = pack
    while t <= min(C, cap):
        if C % t == 0:
            best = t
        t += pack
    return best, pack


def positional_encoding_forward(x, pe, *, donate_x: bool = False):
    """x: (B, C, 64, 64), pe: (1, C, 64, 64) -> x + pe (broadcast over batch)."""
    B, C, Hx, Wx = x.shape
    assert (Hx, Wx) == (H, W), "module hard-codes a 64x64 spatial grid"
    hw = Hx * Wx
    dtype = x.dtype
    itemsize = jnp.dtype(dtype).itemsize

    x3 = x.reshape(B, C, hw)
    pe2 = pe.reshape(C, hw)
    if pe2.dtype != dtype:
        # Callers should build/cache pe in the model dtype (see build_positional_encoding);
        # this cast only fires on a genuine mismatch.
        pe2 = pe2.astype(dtype)

    # Donating x removes the fresh output allocation when the caller no longer needs x.
    io_alias = {0: 0} if donate_x else {}

    # ---- generation-aware sizing -------------------------------------------------
    vmem_cap = _tpu_vmem_capacity_bytes()
    small_vmem_chip = vmem_cap <= 64 * 1024 * 1024        # v7x-like (2 TCs, 64 MiB VMEM)
    # Crossover to the gridded path: low on v7x (megacore + pipelining pays off early),
    # modest elsewhere (and safely inside v5e's 16 MiB default scoped VMEM).
    small_limit = (1 << 20) if small_vmem_chip else (4 << 20)
    # Per-block cap: bigger tiles on 128-MiB-VMEM chips, conservative on v7x.
    max_block_bytes = (2 << 20) if small_vmem_chip else (4 << 20)
    tiled_vmem_limit = (32 << 20) if small_vmem_chip else (64 << 20)

    # Total HBM traffic for this op: read x + read pe + write out.
    total_bytes = (2 * B * C + C) * hw * itemsize

    if total_bytes <= small_limit:
        # Single step, whole problem resident in VMEM: removes the grid-step overhead
        # (~0.35 us/step) that would dominate a sub-MiB elementwise add.
        out = pl.pallas_call(
            _add_pe_single_kernel,
            out_shape=jax.ShapeDtypeStruct((B, C, hw), dtype),
            input_output_aliases=io_alias,
            compiler_params=pltpu.CompilerParams(
                vmem_limit_bytes=min(32 << 20, max(8 << 20, 2 * total_bytes)),
            ),
        )(x3, pe2)
    else:
        # C-tiled, lane-dense (hw = 4096 lanes) pipelined path for large d_model.
        tc, pack = _choose_c_tile(C, itemsize, max_block_bytes)
        if tc is None:
            tc = C  # full-C block is always a legal BlockSpec (block == array dim)
        n_ct = C // tc
        # Guarantee >=2 steps along the leading "parallel" axis when legal so v7x
        # megacore sharding engages (each TC gets its own c-tile range).  Costs one
        # extra (cheap) grid step on single-TC chips.
        if n_ct == 1 and C % (2 * pack) == 0:
            tc = C // 2
            n_ct = 2

        # Grid order: C-tiles outer (parallel), batch INNERMOST (arbitrary).  With b
        # fastest-varying, consecutive steps share the same pe block index -> Pallas
        # skips the pe re-fetch and pe costs C*HW bytes total, not B*C*HW.
        grid = (n_ct, B)
        out = pl.pallas_call(
            _add_pe_tiled_kernel,
            out_shape=jax.ShapeDtypeStruct((B, C, hw), dtype),
            grid=grid,
            in_specs=[
                # None => size-1 squeezed batch dim: kernel sees 2-D (tc, hw) refs.
                pl.BlockSpec((None, tc, hw), lambda c, b: (b, c, 0)),
                # pe block index ignores b; b is innermost so the tile stays resident
                # across all batch steps of a given c-tile.
                pl.BlockSpec((tc, hw), lambda c, b: (c, 0)),
            ],
            out_specs=pl.BlockSpec((None, tc, hw), lambda c, b: (b, c, 0)),
            input_output_aliases=io_alias,
            compiler_params=pltpu.CompilerParams(
                dimension_semantics=("parallel", "arbitrary"),
                vmem_limit_bytes=tiled_vmem_limit,
            ),
        )(x3, pe2)

    return out.reshape(B, C, Hx, Wx)


# TODO(synk): on v5e the residual C*HW pe read could be removed by generating pe
# in-kernel (iota + sin/cos hidden under the DMA) or by parking pe in a persistent
# VMEM scratch; skipped here since the gain shrinks quickly with batch size.
# TODO(synk): for the shipped tiny config (B=2, d_model=8) the real win is fusing this
# add into the adjacent patch-embed op at the model level.


if __name__ == "__main__":
    key = jax.random.PRNGKey(0)

    # --- shipped-style small config: exercises the single-step (no-grid) path ---------
    d_model = 8
    batch = 2
    x = jax.random.normal(key, (batch, d_model, H, W), dtype=jnp.float32)
    pe = build_positional_encoding(d_model, HW, dtype=jnp.float32)
    out = jax.block_until_ready(positional_encoding_forward(x, pe))
    ref = x + pe
    assert out.shape == (batch, d_model, H, W)
    assert jnp.allclose(out, ref, atol=1e-6, rtol=1e-6), "small-path mismatch vs reference"

    # --- larger d_model: exercises the C-tiled path (grid = (C_tiles, B), b innermost) -
    d_model_big = 128
    x2 = jax.random.normal(jax.random.PRNGKey(0), (batch, d_model_big, H, W), dtype=jnp.float32)
    pe_big = build_positional_encoding(d_model_big, HW, dtype=jnp.float32)
    out2 = jax.block_until_ready(positional_encoding_forward(x2, pe_big))
    ref2 = x2 + pe_big
    assert out2.shape == (batch, d_model_big, H, W)
    assert jnp.allclose(out2, ref2, atol=1e-6, rtol=1e-6), "tiled-path mismatch vs reference"

    print("KERNEL_OK")
</pallas_src>

<mosaic_0001>
module attributes {stable_mosaic.version = 11 : i64} {
  func.func @_add_pe_single_kernel(%arg0: memref<2x8x4096xf32, #tpu.memory_space<vmem>>, %arg1: memref<8x4096xf32, #tpu.memory_space<vmem>>, %arg2: memref<2x8x4096xf32, #tpu.memory_space<vmem>>) attributes {dimension_semantics = [], scalar_prefetch = 0 : i64, scratch_operands = 0 : i64, tpu.core_type = #tpu.core_type<tc>} {
    %c0 = arith.constant 0 : index
    %c0_0 = arith.constant 0 : index
    %c0_1 = arith.constant 0 : index
    %0 = vector.load %arg0[%c0, %c0_0, %c0_1] : memref<2x8x4096xf32, #tpu.memory_space<vmem>>, vector<2x8x4096xf32>
    %c0_2 = arith.constant 0 : index
    %c0_3 = arith.constant 0 : index
    %1 = vector.load %arg1[%c0_2, %c0_3] : memref<8x4096xf32, #tpu.memory_space<vmem>>, vector<8x4096xf32>
    %2 = vector.shape_cast %1 : vector<8x4096xf32> to vector<1x8x4096xf32>
    %3 = vector.broadcast %2 : vector<1x8x4096xf32> to vector<2x8x4096xf32>
    %4 = arith.addf %0, %3 : vector<2x8x4096xf32>
    %c0_4 = arith.constant 0 : index
    %c0_5 = arith.constant 0 : index
    %c0_6 = arith.constant 0 : index
    %5 = vector.load %arg2[%c0_4, %c0_5, %c0_6] : memref<2x8x4096xf32, #tpu.memory_space<vmem>>, vector<2x8x4096xf32>
    tpu.vector_store %arg2[%c0_4, %c0_5, %c0_6], %4 {strides = array<i32>} : memref<2x8x4096xf32, #tpu.memory_space<vmem>>, vector<2x8x4096xf32>,
    return
  }
}

</mosaic_0001>

<bundles_post_ra>
// kernel: tpu_custom_call.1
= control target key start
LH: loop header
LB: loop body
LE: loop exit
PB: predicated region body
PF: predicated region fallthrough
CT: control target
= control target key end

     0   :  { %7 = vsyncpa [#allocation3], 0  ;;  %s547_s0 = inlined_call_operand.hbm [shape: f32[2,8,4096], index: 0, kind: input, shape index: {}]   ;;  %s548_s1 = inlined_call_operand.hbm [shape: f32[8,4096], index: 1, kind: input, shape index: {}]   ;;  %s549_s2 = inlined_call_operand.hbm [shape: f32[2,8,4096], index: 2, kind: output, shape index: {}]  }
   0x1   :  { %8 = vsyncpa [#allocation6], 0 }
   0x2   :  { %9 = vsyncpa [#allocation4], 0  ;;  %s357_s9 = smov [#allocation2]   ;;  %s285_s13 = scalar_lea.hbm %s547_s0, 8192 }
   0x3   :  { %s15_s10 = sshll.u32 %s357_s9, 4  ;;  %p286_p0 = scmp.ne.s32.totalorder %s547_s0, %s285_s13  ;;  %s16_s10 = int_to_ptr.vmem [resolvable:$true] %s15_s10 }
   0x4   :  { %p289_p1 = scmp.lt.u32.totalorder %s285_s13, %s547_s0 }
   0x6   :  { %p291_p2 = pnand %p289_p1, %p286_p0 }
   0x8   :  { %294 = shalt.err (!%p291_p2)
}
   0x9   :  { %s295_s18 = scalar_lea.vmem %s16_s10, 8192  ;;  %p300_p4 = scmp.lt.s32.totalorder %s16_s10, %s16_s10 }
   0xa   :  { %p296_p3 = scmp.ne.s32.totalorder %s16_s10, %s295_s18  ;;  %p301_p5 = scmp.lt.s32.totalorder %s295_s18, %s295_s18 }
   0xc   :  { %p302_p6 = por %p301_p5, %p300_p4 }
   0xe   :  { %p303_p7 = pnand %p302_p6, %p296_p3 }
  0x10   :  { %306 = shalt.err (!%p303_p7)
}
  0x11   :  { %s358_s19 = smov 4096   ;;  %s359_s20 = smov 256  }
  0x12   :  { %21 = dma.hbm_to_vmem [thread:$0]  %s547_s0, 8192, %s16_s10, [#allocation3], %s358_s19, %s358_s19, %s359_s20  }
  0x13   :  { %s360_s23 = smov [#allocation5]   ;;  %s307_s27 = scalar_lea.hbm %s548_s1, 4096 }
  0x14   :  { %s28_s24 = sshll.u32 %s360_s23, 4  ;;  %p308_p8 = scmp.ne.s32.totalorder %s548_s1, %s307_s27  ;;  %s29_s24 = int_to_ptr.vmem [resolvable:$true] %s28_s24 }
  0x15   :  { %p311_p9 = scmp.lt.u32.totalorder %s307_s27, %s548_s1 }
  0x17   :  { %p313_p10 = pnand %p311_p9, %p308_p8 }
  0x19   :  { %316 = shalt.err (!%p313_p10)
}
  0x1a   :  { %s317_s4 = scalar_lea.vmem %s29_s24, 4096  ;;  %p322_p12 = scmp.lt.s32.totalorder %s29_s24, %s29_s24 }
  0x1b   :  { %p318_p11 = scmp.ne.s32.totalorder %s29_s24, %s317_s4  ;;  %p323_p13 = scmp.lt.s32.totalorder %s317_s4, %s317_s4 }
  0x1d   :  { %p324_p0 = por %p323_p13, %p322_p12 }
  0x1f   :  { %p325_p1 = pnand %p324_p0, %p318_p11 }
  0x21   :  { %328 = shalt.err (!%p325_p1)
}
  0x22   :  { %31 = dma.hbm_to_vmem [thread:$0]  %s548_s1, 4096, %s29_s24, [#allocation6]  }
  0x23   :  { %351 = dma.done.wait [#allocation3], 8192  }
  0x24   :  { %352 = vsyncadd [#allocation3], 4294959104 }
  0x25   :  { %353 = dma.done.wait [#allocation6], 4096  }
  0x26   :  { %354 = vsyncadd [#allocation6], 4294963200  ;;  %v38_v0 = vld [vmem:[#allocation2] sm:$0xff]  ;;  %v39_v2 = vld [vmem:[#allocation2 + $0x8] sm:$0xff]  ;;  %s361_s1 = smov [#allocation7]  }
  0x27   :  { %v404_v1 = vld [vmem:[#allocation5] sm:$0xff]  ;;  %v407_v4 = vld [vmem:[#allocation5 + $0x8] sm:$0xff]  ;;  %v40_v5 = vld [vmem:[#allocation2 + $0x10] sm:$0xff]  ;;  %s267_s6 = sshll.u32 %s361_s1, 4  ;;  %s268_s6 = int_to_ptr.vmem [resolvable:$true] %s267_s6 }
  0x28   :  { %v134_v3 = vadd.f32 %v404_v1, %v38_v0  ;;  %v409_v6 = vld [vmem:[#allocation5 + $0x10] sm:$0xff]  ;;  %v135_v7 = vadd.f32 %v407_v4, %v39_v2  ;;  %v41_v9 = vld [vmem:[#allocation2 + $0x18] sm:$0xff]  ;;  %v42_v11 = vld [vmem:[#allocation2 + $0x20] sm:$0xff]  ;;  %s329_s7 = scalar_lea.vmem %s268_s6, 8192  ;;  %p334_p3 = scmp.lt.s32.totalorder %s268_s6, %s268_s6 }
  0x29   :  { %v136_v8 = vadd.f32 %v409_v6, %v40_v5  ;;  %v413_v10 = vld [vmem:[#allocation5 + $0x18] sm:$0xff]  ;;  %v416_v13 = vld [vmem:[#allocation5 + $0x20] sm:$0xff]  ;;  %v43_v14 = vld [vmem:[#allocation2 + $0x28] sm:$0xff]  ;;  %p330_p2 = scmp.ne.s32.totalorder %s268_s6, %s329_s7  ;;  %p335_p4 = scmp.lt.s32.totalorder %s329_s7, %s329_s7 }
  0x2a   :  { %198 = vst [vmem:[#allocation7] sm:$0xff] %v134_v3  ;;  %v137_v12 = vadd.f32 %v413_v10, %v41_v9  ;;  %v418_v15 = vld [vmem:[#allocation5 + $0x28] sm:$0xff]  ;;  %199 = vst [vmem:[#allocation7 + $0x8] sm:$0xff] %v135_v7  ;;  %v138_v16 = vadd.f32 %v416_v13, %v42_v11  ;;  %v44_v18 = vld [vmem:[#allocation2 + $0x30] sm:$0xff] }
  0x2b   :  { %200 = vst [vmem:[#allocation7 + $0x10] sm:$0xff] %v136_v8  ;;  %v139_v17 = vadd.f32 %v418_v15, %v43_v14  ;;  %v422_v19 = vld [vmem:[#allocation5 + $0x30] sm:$0xff]  ;;  %v45_v20 = vld [vmem:[#allocation2 + $0x38] sm:$0xff]  ;;  %v46_v23 = vld [vmem:[#allocation2 + $0x40] sm:$0xff]  ;;  %p336_p5 = por %p335_p4, %p334_p3 }
  0x2c   :  { %201 = vst [vmem:[#allocation7 + $0x18] sm:$0xff] %v137_v12  ;;  %v140_v21 = vadd.f32 %v422_v19, %v44_v18  ;;  %v425_v22 = vld [vmem:[#allocation5 + $0x38] sm:$0xff]  ;;  %v427_v24 = vld [vmem:[#allocation5 + $0x40] sm:$0xff]  ;;  %202 = vst [vmem:[#allocation7 + $0x20] sm:$0xff] %v138_v16 }
  0x2d   :  { %203 = vst [vmem:[#allocation7 + $0x28] sm:$0xff] %v139_v17  ;;  %v141_v25 = vadd.f32 %v425_v22, %v45_v20  ;;  %v142_v26 = vadd.f32 %v427_v24, %v46_v23  ;;  %v47_v27 = vld [vmem:[#allocation2 + $0x48] sm:$0xff]  ;;  %v48_v29 = vld [vmem:[#allocation2 + $0x50] sm:$0xff]  ;;  %v49_v32 = vld [vmem:[#allocation2 + $0x58] sm:$0xff]  ;;  %p337_p6 = pnand %p336_p5, %p330_p2 }
  0x2e   :  { %v431_v28 = vld [vmem:[#allocation5 + $0x48] sm:$0xff]  ;;  %204 = vst [vmem:[#allocation7 + $0x30] sm:$0xff] %v140_v21  ;;  %v434_v31 = vld [vmem:[#allocation5 + $0x50] sm:$0xff]  ;;  %v436_v33 = vld [vmem:[#allocation5 + $0x58] sm:$0xff] }
  0x2f   :  { %v143_v30 = vadd.f32 %v431_v28, %v47_v27  ;;  %205 = vst [vmem:[#allocation7 + $0x38] sm:$0xff] %v141_v25  ;;  %206 = vst [vmem:[#allocation7 + $0x40] sm:$0xff] %v142_v26  ;;  %v144_v34 = vadd.f32 %v434_v31, %v48_v29  ;;  %v145_v35 = vadd.f32 %v436_v33, %v49_v32  ;;  %v50_v36 = vld [vmem:[#allocation2 + $0x60] sm:$0xff]  ;;  %v51_v38 = vld [vmem:[#allocation2 + $0x68] sm:$0xff] }
  0x30   :  { %v440_v37 = vld [vmem:[#allocation5 + $0x60] sm:$0xff]  ;;  %v443_v40 = vld [vmem:[#allocation5 + $0x68] sm:$0xff]  ;;  %v52_v41 = vld [vmem:[#allocation2 + $0x70] sm:$0xff] }
  0x31   :  { %207 = vst [vmem:[#allocation7 + $0x48] sm:$0xff] %v143_v30  ;;  %v146_v39 = vadd.f32 %v440_v37, %v50_v36  ;;  %v445_v42 = vld [vmem:[#allocation5 + $0x70] sm:$0xff]  ;;  %208 = vst [vmem:[#allocation7 + $0x50] sm:$0xff] %v144_v34  ;;  %v147_v43 = vadd.f32 %v443_v40, %v51_v38  ;;  %v53_v45 = vld [vmem:[#allocation2 + $0x78] sm:$0xff] }
  0x32   :  { %209 = vst [vmem:[#allocation7 + $0x58] sm:$0xff] %v145_v35  ;;  %v148_v44 = vadd.f32 %v445_v42, %v52_v41  ;;  %v449_v46 = vld [vmem:[#allocation5 + $0x78] sm:$0xff]  ;;  %v54_v47 = vld [vmem:[#allocation2 + $0x80] sm:$0xff]  ;;  %v55_v50 = vld [vmem:[#allocation2 + $0x88] sm:$0xff] }
  0x33   :  { %210 = vst [vmem:[#allocation7 + $0x60] sm:$0xff] %v146_v39  ;;  %v149_v48 = vadd.f32 %v449_v46, %v53_v45  ;;  %v452_v49 = vld [vmem:[#allocation5 + $0x80] sm:$0xff]  ;;  %v454_v51 = vld [vmem:[#allocation5 + $0x88] sm:$0xff]  ;;  %211 = vst [vmem:[#allocation7 + $0x68] sm:$0xff] %v147_v43 }
  0x34   :  { %212 = vst [vmem:[#allocation7 + $0x70] sm:$0xff] %v148_v44  ;;  %v150_v52 = vadd.f32 %v452_v49, %v54_v47  ;;  %v151_v53 = vadd.f32 %v454_v51, %v55_v50  ;;  %v56_v54 = vld [vmem:[#allocation2 + $0x90] sm:$0xff]  ;;  %v57_v56 = vld [vmem:[#allocation2 + $0x98] sm:$0xff]  ;;  %v58_v59 = vld [vmem:[#allocation2 + $0xa0] sm:$0xff] }
  0x35   :  { %v458_v55 = vld [vmem:[#allocation5 + $0x90] sm:$0xff]  ;;  %213 = vst [vmem:[#allocation7 + $0x78] sm:$0xff] %v149_v48  ;;  %v461_v58 = vld [vmem:[#allocation5 + $0x98] sm:$0xff]  ;;  %v463_v60 = vld [vmem:[#allocation5 + $0xa0] sm:$0xff] }
  0x36   :  { %v152_v57 = vadd.f32 %v458_v55, %v56_v54  ;;  %214 = vst [vmem:[#allocation7 + $0x80] sm:$0xff] %v150_v52  ;;  %215 = vst [vmem:[#allocation7 + $0x88] sm:$0xff] %v151_v53  ;;  %v153_v61 = vadd.f32 %v461_v58, %v57_v56  ;;  %v154_v62 = vadd.f32 %v463_v60, %v58_v59  ;;  %v59_v63 = vld [vmem:[#allocation2 + $0xa8] sm:$0xff]  ;;  %v60_v2 = vld [vmem:[#allocation2 + $0xb0] sm:$0xff] }
  0x37   :  { %v467_v0 = vld [vmem:[#allocation5 + $0xa8] sm:$0xff]  ;;  %v470_v5 = vld [vmem:[#allocation5 + $0xb0] sm:$0xff]  ;;  %v61_v7 = vld [vmem:[#allocation2 + $0xb8] sm:$0xff] }
  0x38   :  { %216 = vst [vmem:[#allocation7 + $0x90] sm:$0xff] %v152_v57  ;;  %v155_v3 = vadd.f32 %v467_v0, %v59_v63  ;;  %v472_v8 = vld [vmem:[#allocation5 + $0xb8] sm:$0xff]  ;;  %217 = vst [vmem:[#allocation7 + $0x98] sm:$0xff] %v153_v61  ;;  %v156_v9 = vadd.f32 %v470_v5, %v60_v2  ;;  %v62_v12 = vld [vmem:[#allocation2 + $0xc0] sm:$0xff] }
  0x39   :  { %218 = vst [vmem:[#allocation7 + $0xa0] sm:$0xff] %v154_v62  ;;  %v157_v11 = vadd.f32 %v472_v8, %v61_v7  ;;  %v476_v14 = vld [vmem:[#allocation5 + $0xc0] sm:$0xff]  ;;  %v63_v16 = vld [vmem:[#allocation2 + $0xc8] sm:$0xff]  ;;  %v64_v20 = vld [vmem:[#allocation2 + $0xd0] sm:$0xff] }
  0x3a   :  { %219 = vst [vmem:[#allocation7 + $0xa8] sm:$0xff] %v155_v3  ;;  %v158_v17 = vadd.f32 %v476_v14, %v62_v12  ;;  %v479_v18 = vld [vmem:[#allocation5 + $0xc8] sm:$0xff]  ;;  %v481_v21 = vld [vmem:[#allocation5 + $0xd0] sm:$0xff]  ;;  %220 = vst [vmem:[#allocation7 + $0xb0] sm:$0xff] %v156_v9 }
  0x3b   :  { %221 = vst [vmem:[#allocation7 + $0xb8] sm:$0xff] %v157_v11  ;;  %v159_v23 = vadd.f32 %v479_v18, %v63_v16  ;;  %v160_v25 = vadd.f32 %v481_v21, %v64_v20  ;;  %v65_v26 = vld [vmem:[#allocation2 + $0xd8] sm:$0xff]  ;;  %v66_v29 = vld [vmem:[#allocation2 + $0xe0] sm:$0xff]  ;;  %v67_v34 = vld [vmem:[#allocation2 + $0xe8] sm:$0xff] }
  0x3c   :  { %v485_v27 = vld [vmem:[#allocation5 + $0xd8] sm:$0xff]  ;;  %222 = vst [vmem:[#allocation7 + $0xc0] sm:$0xff] %v158_v17  ;;  %v488_v32 = vld [vmem:[#allocation5 + $0xe0] sm:$0xff]  ;;  %v490_v35 = vld [vmem:[#allocation5 + $0xe8] sm:$0xff] }
  0x3d   :  { %v161_v30 = vadd.f32 %v485_v27, %v65_v26  ;;  %223 = vst [vmem:[#allocation7 + $0xc8] sm:$0xff] %v159_v23  ;;  %224 = vst [vmem:[#allocation7 + $0xd0] sm:$0xff] %v160_v25  ;;  %v162_v36 = vadd.f32 %v488_v32, %v66_v29  ;;  %v163_v38 = vadd.f32 %v490_v35, %v67_v34  ;;  %v68_v39 = vld [vmem:[#allocation2 + $0xf0] sm:$0xff]  ;;  %v69_v43 = vld [vmem:[#allocation2 + $0xf8] sm:$0xff] }
  0x3e   :  { %v494_v41 = vld [vmem:[#allocation5 + $0xf0] sm:$0xff]  ;;  %v497_v45 = vld [vmem:[#allocation5 + $0xf8] sm:$0xff]  ;;  %v70_v47 = vld [vmem:[#allocation2 + $0x100] sm:$0xff] }
  0x3f   :  { %225 = vst [vmem:[#allocation7 + $0xd8] sm:$0xff] %v161_v30  ;;  %v164_v44 = vadd.f32 %v494_v41, %v68_v39  ;;  %v71_v48 = vld [vmem:[#allocation2 + $0x108] sm:$0xff]  ;;  %226 = vst [vmem:[#allocation7 + $0xe0] sm:$0xff] %v162_v36  ;;  %v165_v50 = vadd.f32 %v497_v45, %v69_v43  ;;  %v166_v52 = vadd.f32 %v404_v1, %v70_v47  ;;  %v72_v54 = vld [vmem:[#allocation2 + $0x110] sm:$0xff] }
  0x40   :  { %227 = vst [vmem:[#allocation7 + $0xe8] sm:$0xff] %v163_v38  ;;  %v167_v53 = vadd.f32 %v407_v4, %v71_v48  ;;  %v73_v56 = vld [vmem:[#allocation2 + $0x118] sm:$0xff]  ;;  %v74_v57 = vld [vmem:[#allocation2 + $0x120] sm:$0xff]  ;;  %v168_v59 = vadd.f32 %v409_v6, %v72_v54  ;;  %v75_v63 = vld [vmem:[#allocation2 + $0x128] sm:$0xff] }
  0x41   :  { %228 = vst [vmem:[#allocation7 + $0xf0] sm:$0xff] %v164_v44  ;;  %v169_v61 = vadd.f32 %v413_v10, %v73_v56  ;;  %v170_v62 = vadd.f32 %v416_v13, %v74_v57  ;;  %v76_v2 = vld [vmem:[#allocation2 + $0x130] sm:$0xff]  ;;  %v77_v3 = vld [vmem:[#allocation2 + $0x138] sm:$0xff]  ;;  %229 = vst [vmem:[#allocation7 + $0xf8] sm:$0xff] %v165_v50  ;;  %v171_v1 = vadd.f32 %v418_v15, %v75_v63 }
  0x42   :  { %230 = vst [vmem:[#allocation7 + $0x100] sm:$0xff] %v166_v52  ;;  %231 = vst [vmem:[#allocation7 + $0x108] sm:$0xff] %v167_v53  ;;  %v172_v4 = vadd.f32 %v422_v19, %v76_v2  ;;  %v173_v7 = vadd.f32 %v425_v22, %v77_v3  ;;  %v78_v9 = vld [vmem:[#allocation2 + $0x140] sm:$0xff]  ;;  %v79_v11 = vld [vmem:[#allocation2 + $0x148] sm:$0xff] }
  0x43   :  { %v80_v12 = vld [vmem:[#allocation2 + $0x150] sm:$0xff]  ;;  %232 = vst [vmem:[#allocation7 + $0x110] sm:$0xff] %v168_v59  ;;  %233 = vst [vmem:[#allocation7 + $0x118] sm:$0xff] %v169_v61  ;;  %v174_v6 = vadd.f32 %v427_v24, %v78_v9  ;;  %v175_v10 = vadd.f32 %v431_v28, %v79_v11  ;;  %v81_v16 = vld [vmem:[#allocation2 + $0x158] sm:$0xff] }
  0x44   :  { %234 = vst [vmem:[#allocation7 + $0x120] sm:$0xff] %v170_v62  ;;  %v176_v13 = vadd.f32 %v434_v31, %v80_v12  ;;  %v82_v17 = vld [vmem:[#allocation2 + $0x160] sm:$0xff]  ;;  %v83_v20 = vld [vmem:[#allocation2 + $0x168] sm:$0xff]  ;;  %235 = vst [vmem:[#allocation7 + $0x128] sm:$0xff] %v171_v1  ;;  %v177_v15 = vadd.f32 %v436_v33, %v81_v16 }
  0x45   :  { %236 = vst [vmem:[#allocation7 + $0x130] sm:$0xff] %v172_v4  ;;  %237 = vst [vmem:[#allocation7 + $0x138] sm:$0xff] %v173_v7  ;;  %v178_v19 = vadd.f32 %v440_v37, %v82_v17  ;;  %v179_v22 = vadd.f32 %v443_v40, %v83_v20  ;;  %v84_v23 = vld [vmem:[#allocation2 + $0x170] sm:$0xff]  ;;  %v85_v25 = vld [vmem:[#allocation2 + $0x178] sm:$0xff] }
  0x46   :  { %v86_v26 = vld [vmem:[#allocation2 + $0x180] sm:$0xff]  ;;  %238 = vst [vmem:[#allocation7 + $0x140] sm:$0xff] %v174_v6  ;;  %239 = vst [vmem:[#allocation7 + $0x148] sm:$0xff] %v175_v10  ;;  %v180_v24 = vadd.f32 %v445_v42, %v84_v23  ;;  %v181_v28 = vadd.f32 %v449_v46, %v85_v25  ;;  %v87_v29 = vld [vmem:[#allocation2 + $0x188] sm:$0xff] }
  0x47   :  { %240 = vst [vmem:[#allocation7 + $0x150] sm:$0xff] %v176_v13  ;;  %v182_v31 = vadd.f32 %v452_v49, %v86_v26  ;;  %v88_v30 = vld [vmem:[#allocation2 + $0x190] sm:$0xff]  ;;  %v89_v34 = vld [vmem:[#allocation2 + $0x198] sm:$0xff]  ;;  %241 = vst [vmem:[#allocation7 + $0x158] sm:$0xff] %v177_v15  ;;  %v183_v33 = vadd.f32 %v454_v51, %v87_v29 }
  0x48   :  { %242 = vst [vmem:[#allocation7 + $0x160] sm:$0xff] %v178_v19  ;;  %243 = vst [vmem:[#allocation7 + $0x168] sm:$0xff] %v179_v22  ;;  %v184_v37 = vadd.f32 %v458_v55, %v88_v30  ;;  %v185_v40 = vadd.f32 %v461_v58, %v89_v34  ;;  %v90_v36 = vld [vmem:[#allocation2 + $0x1a0] sm:$0xff]  ;;  %v91_v38 = vld [vmem:[#allocation2 + $0x1a8] sm:$0xff] }
  0x49   :  { %v92_v39 = vld [vmem:[#allocation2 + $0x1b0] sm:$0xff]  ;;  %244 = vst [vmem:[#allocation7 + $0x170] sm:$0xff] %v180_v24  ;;  %245 = vst [vmem:[#allocation7 + $0x178] sm:$0xff] %v181_v28  ;;  %v186_v42 = vadd.f32 %v463_v60, %v90_v36  ;;  %v187_v46 = vadd.f32 %v467_v0, %v91_v38  ;;  %v93_v43 = vld [vmem:[#allocation2 + $0x1b8] sm:$0xff] }
  0x4a   :  { %246 = vst [vmem:[#allocation7 + $0x180] sm:$0xff] %v182_v31  ;;  %v188_v49 = vadd.f32 %v470_v5, %v92_v39  ;;  %v94_v44 = vld [vmem:[#allocation2 + $0x1c0] sm:$0xff]  ;;  %v95_v47 = vld [vmem:[#allocation2 + $0x1c8] sm:$0xff]  ;;  %247 = vst [vmem:[#allocation7 + $0x188] sm:$0xff] %v183_v33  ;;  %v189_v51 = vadd.f32 %v472_v8, %v93_v43 }
  0x4b   :  { %248 = vst [vmem:[#allocation7 + $0x190] sm:$0xff] %v184_v37  ;;  %249 = vst [vmem:[#allocation7 + $0x198] sm:$0xff] %v185_v40  ;;  %v190_v55 = vadd.f32 %v476_v14, %v94_v44  ;;  %v191_v58 = vadd.f32 %v479_v18, %v95_v47  ;;  %v96_v48 = vld [vmem:[#allocation2 + $0x1d0] sm:$0xff]  ;;  %v97_v60 = vld [vmem:[#allocation2 + $0x1d8] sm:$0xff] }
  0x4c   :  { %v98_v50 = vld [vmem:[#allocation2 + $0x1e0] sm:$0xff]  ;;  %250 = vst [vmem:[#allocation7 + $0x1a0] sm:$0xff] %v186_v42  ;;  %251 = vst [vmem:[#allocation7 + $0x1a8] sm:$0xff] %v187_v46  ;;  %v192_v0 = vadd.f32 %v481_v21, %v96_v48  ;;  %v193_v5 = vadd.f32 %v485_v27, %v97_v60  ;;  %v99_v53 = vld [vmem:[#allocation2 + $0x1e8] sm:$0xff] }
  0x4d   :  { %252 = vst [vmem:[#allocation7 + $0x1b0] sm:$0xff] %v188_v49  ;;  %v194_v52 = vadd.f32 %v488_v32, %v98_v50  ;;  %v100_v54 = vld [vmem:[#allocation2 + $0x1f0] sm:$0xff]  ;;  %v101_v56 = vld [vmem:[#allocation2 + $0x1f8] sm:$0xff]  ;;  %253 = vst [vmem:[#allocation7 + $0x1b8] sm:$0xff] %v189_v51  ;;  %v195_v8 = vadd.f32 %v490_v35, %v99_v53 }
  0x4e   :  { %254 = vst [vmem:[#allocation7 + $0x1c0] sm:$0xff] %v190_v55  ;;  %255 = vst [vmem:[#allocation7 + $0x1c8] sm:$0xff] %v191_v58  ;;  %v196_v14 = vadd.f32 %v494_v41, %v100_v54  ;;  %v197_v18 = vadd.f32 %v497_v45, %v101_v56 }
  0x4f   :  { %256 = vst [vmem:[#allocation7 + $0x1d0] sm:$0xff] %v192_v0  ;;  %257 = vst [vmem:[#allocation7 + $0x1d8] sm:$0xff] %v193_v5 }
  0x50   :  { %258 = vst [vmem:[#allocation7 + $0x1e0] sm:$0xff] %v194_v52  ;;  %259 = vst [vmem:[#allocation7 + $0x1e8] sm:$0xff] %v195_v8 }
  0x51   :  { %260 = vst [vmem:[#allocation7 + $0x1f0] sm:$0xff] %v196_v14  ;;  %261 = vst [vmem:[#allocation7 + $0x1f8] sm:$0xff] %v197_v18 }
  0x52   :  { %340 = shalt.err (!%p337_p6)
}
  0x53   :  { %s341_s10 = scalar_lea.hbm %s549_s2, 8192 }
  0x54   :  { %p342_p7 = scmp.ne.s32.totalorder %s549_s2, %s341_s10  ;;  %p345_p8 = scmp.lt.u32.totalorder %s341_s10, %s549_s2 }
  0x56   :  { %p347_p9 = pnand %p345_p8, %p342_p7 }
  0x58   :  { %350 = shalt.err (!%p347_p9)
}
  0x59   :  { %273 = dma.vmem_to_hbm [thread:$0]  %s268_s6, 8192, %s549_s2, [#allocation4], %s358_s19, %s358_s19, %s359_s20  }
  0x5a   :  { %355 = dma.done.wait [#allocation4], 8192  }
  0x5b   :  { %356 = vsyncadd [#allocation4], 4294959104 }
  0x5c   :  { %277 = vsyncpa [#allocation3], 1 }
  0x5d   :  { %278 = vsyncpa [#allocation6], 1 }
  0x5e   :  { %279 = vsyncpa [#allocation4], 1 }

</bundles_post_ra>
